<compile_context>
chip_gen: v5e
topology: v5e:2x2
jax: 0.10.0
libtpu: 0.0.40
codegen_flags: <defaults>
</compile_context>

<pallas_src>
import jax
import jax.numpy as jnp
from jax.experimental import pallas as pl
from jax.experimental.pallas import tpu as pltpu

LANES = 128     # logit-slab width (rows 0:10 shared/disease logits, 10:12 domain)
W_ROWS = 368    # packed bf16 weight-slab rows (16-row aligned sections)
B_ROWS = 128    # packed f32 bias-slab rows


# ------------------------------- Pallas kernel --------------------------------
def make_dan_kernel(K, P, TB):
    """Fused forward kernel for one batch tile of TB images, P stem pixels each."""
    inv_p = 1.0 / float(P)

    def dan_kernel(pT_ref, w_ref, b_ref, out_ref):
        # pT_ref : [1, K, TB*P] bf16  transposed im2col patches (batch-major groups of P)
        # w_ref  : [W_ROWS, 128] bf16 packed weight slab (resident)
        # b_ref  : [B_ROWS, 8]   f32  packed bias slab   (resident)
        # out_ref: [1, 128, TB]  f32  transposed logit slab

        # --- stem conv (3x3 s2) as one lane-dense MXU matmul + bias + SiLU ---
        yT = jnp.dot(w_ref[0:32, 0:K], pT_ref[0],
                     preferred_element_type=jnp.float32)            # [32, TB*P] f32
        yT = yT + b_ref[0:32, 0:1]                                   # stem bias (column bcast)
        yT = yT * jax.nn.sigmoid(yT)                                 # SiLU (f32, EUP)

        # --- global average pool: per-image lane-segment reduction, no HBM mask ---
        cols = [jnp.sum(yT[:, b * P:(b + 1) * P], axis=-1, keepdims=True)
                for b in range(TB)]
        featT = (cols[0] if TB == 1 else jnp.concatenate(cols, axis=-1)) * inv_p
        fT = featT.astype(jnp.bfloat16)                              # [32, TB]

        # --- fused heads (channel-major; backbone head folded offline) ---
        hT = jnp.dot(w_ref[32:96, 0:32], fT,
                     preferred_element_type=jnp.float32) + b_ref[0:64, 1:2]
        hT = jnp.maximum(hT, 0.0)                                    # [64, TB] relu(preFinal||domain-L1)
        hTb = hT.astype(jnp.bfloat16)

        dT = jnp.dot(w_ref[224:232, 0:64], hTb,
                     preferred_element_type=jnp.float32) + b_ref[0:8, 2:3]
        dT = jnp.maximum(dT, 0.0)                                    # [8, TB]  relu(domain-L2)

        outT = (jnp.dot(w_ref[96:224, 0:64], hTb,                    # outlayer   -> rows 0:10
                        preferred_element_type=jnp.float32)
                + jnp.dot(w_ref[240:368, 0:8], dT.astype(jnp.bfloat16),
                          preferred_element_type=jnp.float32)        # domain-L3  -> rows 10:12
                + b_ref[:, 3:4])                                     # [128, TB]
        out_ref[0] = outT

    return dan_kernel


# -------------------------------- glue helpers ---------------------------------
def im2col(x_nhwc, kh, kw, stride, pad):
    """Extract conv patches: returns ([B, oh*ow, kh*kw*C], oh, ow)."""
    x = jnp.pad(x_nhwc, ((0, 0), (pad, pad), (pad, pad), (0, 0)))
    B, H, W, C = x.shape
    oh = (H - kh) // stride + 1
    ow = (W - kw) // stride + 1
    cols = []
    for i in range(kh):
        for j in range(kw):
            cols.append(x[:, i:i + oh * stride:stride,
                          j:j + ow * stride:stride, :])              # [B, oh, ow, C]
    patches = jnp.stack(cols, axis=-2)                                # [B, oh, ow, kh*kw, C]
    return patches.reshape(B, oh * ow, kh * kw * C), oh, ow


def make_params(key):
    def init(k, shape, scale=0.1):
        return (scale * jax.random.normal(k, shape)).astype(jnp.float32)

    ks = jax.random.split(key, 14)
    return {
        # stem conv 3x3 s2, 3 -> 32 channels (weight stored as [kh*kw*C_in, C_out])
        'wc':  init(ks[0], (3 * 3 * 3, 32)), 'bc':  init(ks[1], (1, 32)),
        # backbone classifier head 32 -> 64 (timm num_classes=64)
        'wh':  init(ks[2], (32, 64)),        'bh':  init(ks[3], (1, 64)),
        # preFinal 64 -> 32, outlayer 32 -> 10
        'w1':  init(ks[4], (64, 32)),        'b1':  init(ks[5], (1, 32)),
        'w2':  init(ks[6], (32, 10)),        'b2':  init(ks[7], (1, 10)),
        # domain head 64 -> 32 -> 8 -> 2
        'wd1': init(ks[8], (64, 32)),        'bd1': init(ks[9], (1, 32)),
        'wd2': init(ks[10], (32, 8)),        'bd2': init(ks[11], (1, 8)),
        'wd3': init(ks[12], (8, 2)),         'bd3': init(ks[13], (1, 2)),
    }


def fuse_head_params(params):
    """Fold the (purely linear) backbone classifier head into preFinal || domain-L1."""
    w1d = jnp.concatenate([params['w1'], params['wd1']], axis=1)      # [64, 64]
    b1d = jnp.concatenate([params['b1'], params['bd1']], axis=1)      # [1, 64]
    wf = params['wh'] @ w1d                                           # [32, 64]
    bf = params['bh'] @ w1d + b1d                                     # [1, 64]
    return wf, bf


def pack_weight_slab(params, K):
    """All weights in one lane-dense bf16 slab (static row offsets, 16-aligned)."""
    wf, _ = fuse_head_params(params)
    slab = (jnp.zeros((W_ROWS, LANES), jnp.float32)
            .at[0:32, 0:K].set(params['wc'].T)            # stem conv^T                rows   0: 32
            .at[32:96, 0:32].set(wf.T)                    # (head@preFinal||dom-L1)^T  rows  32: 96
            .at[96:106, 0:32].set(params['w2'].T)         # outlayer^T  (logits 0:10)  rows  96:224
            .at[224:232, 32:64].set(params['wd2'].T)      # domain-L2^T                rows 224:232
            .at[250:252, 0:8].set(params['wd3'].T))       # domain-L3^T (logits 10:12) rows 240:368
    return slab.astype(jnp.bfloat16)


def pack_bias_slab(params):
    """All biases in one small f32 slab, stored as columns (channel-major kernel)."""
    _, bf = fuse_head_params(params)
    return (jnp.zeros((B_ROWS, 8), jnp.float32)
            .at[0:32, 0].set(params['bc'][0])             # stem bias
            .at[0:64, 1].set(bf[0])                       # fused preFinal||domain-L1 bias
            .at[0:8, 2].set(params['bd2'][0])             # domain-L2 bias
            .at[0:10, 3].set(params['b2'][0])             # outlayer bias   -> logits 0:10
            .at[10:12, 3].set(params['bd3'][0]))          # domain-L3 bias  -> logits 10:12


def domain_adaptive_net(x_nchw, params, block_batch=None):
    """x_nchw: [B, 3, H, W] float32 (PyTorch layout). Returns (shared, disease, domain)."""
    B = x_nchw.shape[0]
    x_nhwc = jnp.transpose(x_nchw, (0, 2, 3, 1))                       # NCHW -> NHWC
    patches, oh, ow = im2col(x_nhwc, kh=3, kw=3, stride=2, pad=1)      # [B, P, K]
    P = oh * ow
    K = patches.shape[-1]

    # --- batch-tile: thousands of stem rows per step, >=2 grid steps (v7x megacore) ---
    if block_batch is None:
        tb = max(1, min(B, 8192 // max(P, 1), 16))
        if B >= 2:
            tb = min(tb, max(1, B // 2))
    else:
        tb = max(1, min(int(block_batch), B))
    while B % tb:
        tb -= 1
    G = B // tb
    rows = tb * P

    # --- lane-dense transposed patch stream [G, K, rows] in bf16 ---
    pT = (patches.reshape(G, tb, P, K)
                 .transpose(0, 3, 1, 2)
                 .reshape(G, K, rows)
                 .astype(jnp.bfloat16))

    wslab = pack_weight_slab(params, K)
    bslab = pack_bias_slab(params)

    # --- VMEM budget from the actual buffers (streamed tile + f32 temps + slabs) ---
    kpad = -(-K // 16) * 16
    rpad = -(-rows // 128) * 128
    need = (2 * kpad * rpad * 2           # streamed patches tile (bf16, double-buffered)
            + 4 * 32 * rpad * 4           # yT / SiLU / pooling temporaries (f32, headroom)
            + 2 * wslab.size * 2          # resident packed weights (double-buffered)
            + (1 << 20))                  # bias slab, head tiles, output, slack
    vmem_bytes = int(min(max(2 * need, 16 << 20), 48 << 20))

    flops = (2 * B * P * K * 32 + B * P * 32
             + 2 * B * (32 * 64 + 64 * LANES + 64 * 8 + 8 * LANES))
    cost = pl.CostEstimate(
        flops=int(flops),
        transcendentals=int(B * P * 32),
        bytes_accessed=int(pT.size * 2 + wslab.size * 2 + bslab.size * 4
                           + B * LANES * 4))

    kernel = make_dan_kernel(K, P, tb)
    out = pl.pallas_call(
        kernel,
        out_shape=jax.ShapeDtypeStruct((G, LANES, tb), jnp.float32),
        grid=(G,),
        in_specs=[
            pl.BlockSpec((1, K, rows), lambda i: (i, 0, 0)),           # patches^T (streamed)
            pl.BlockSpec((W_ROWS, LANES), lambda i: (0, 0)),           # packed bf16 weights
            pl.BlockSpec((B_ROWS, 8), lambda i: (0, 0)),               # packed f32 biases
        ],
        out_specs=pl.BlockSpec((1, LANES, tb), lambda i: (i, 0, 0)),
        compiler_params=pltpu.CompilerParams(
            dimension_semantics=("parallel",),
            vmem_limit_bytes=vmem_bytes),
        cost_estimate=cost,
    )(pT, wslab, bslab)

    slab = out.transpose(0, 2, 1).reshape(B, LANES)
    shared = slab[:, 0:10]
    disease = slab[:, 0:10]     # classificationLayer reuses the effnet head -> identical values
    domain = slab[:, 10:12]
    return shared, disease, domain


# ------------------------- pure-JAX reference (for checking) -------------------
def reference_forward(x_nchw, params):
    x_nhwc = jnp.transpose(x_nchw, (0, 2, 3, 1))
    patches, _, _ = im2col(x_nhwc, kh=3, kw=3, stride=2, pad=1)
    y = jnp.einsum('bpk,kc->bpc', patches.astype(jnp.bfloat16),
                   params['wc'].astype(jnp.bfloat16),
                   preferred_element_type=jnp.float32) + params['bc'][None]
    y = y * jax.nn.sigmoid(y)
    feat = jnp.mean(y, axis=1)
    f64 = feat @ params['wh'] + params['bh']
    h = jnp.maximum(f64 @ params['w1'] + params['b1'], 0.0)
    shared = h @ params['w2'] + params['b2']
    d = jnp.maximum(f64 @ params['wd1'] + params['bd1'], 0.0)
    d = jnp.maximum(d @ params['wd2'] + params['bd2'], 0.0)
    domain = d @ params['wd3'] + params['bd3']
    return shared, shared, domain


# ------------------------------------ main -------------------------------------
if __name__ == "__main__":
    key = jax.random.PRNGKey(0)
    k_x, k_p = jax.random.split(key)

    # small RGB input consistent with the conv backbone: batch=2, 3 channels, 16x16
    x = jax.random.normal(k_x, (2, 3, 16, 16), dtype=jnp.float32)
    params = make_params(k_p)

    # default tiling: tb=1, G=2 (exercises the grid / both v7x TensorCores)
    fwd = jax.jit(domain_adaptive_net)
    shared, disease, domain = jax.block_until_ready(fwd(x, params))
    assert shared.shape == (2, 10)
    assert disease.shape == (2, 10)
    assert domain.shape == (2, 2)

    r_shared, r_disease, r_domain = jax.block_until_ready(jax.jit(reference_forward)(x, params))
    assert bool(jnp.allclose(shared, r_shared, atol=5e-3, rtol=5e-2))
    assert bool(jnp.allclose(disease, r_disease, atol=5e-3, rtol=5e-2))
    assert bool(jnp.allclose(domain, r_domain, atol=5e-3, rtol=5e-2))

    # exercise the multi-image-per-tile pooling path (tb=2, single grid step)
    fwd2 = jax.jit(lambda xx, pp: domain_adaptive_net(xx, pp, block_batch=2))
    s2, _, d2 = jax.block_until_ready(fwd2(x, params))
    assert bool(jnp.allclose(s2, r_shared, atol=5e-3, rtol=5e-2))
    assert bool(jnp.allclose(d2, r_domain, atol=5e-3, rtol=5e-2))

    print("KERNEL_OK")
</pallas_src>

<mosaic_0001>
module attributes {stable_mosaic.version = 11 : i64} {
  func.func @dan_kernel(%arg0: i32, %arg1: memref<1x27x64xbf16, #tpu.memory_space<vmem>>, %arg2: memref<368x128xbf16, #tpu.memory_space<vmem>>, %arg3: memref<128x8xf32, #tpu.memory_space<vmem>>, %arg4: memref<1x128x1xf32, #tpu.memory_space<vmem>>) attributes {dimension_semantics = [#tpu.dimension_semantics<parallel>], iteration_bounds = array<i64: 2>, scalar_prefetch = 0 : i64, scratch_operands = 0 : i64, tpu.core_type = #tpu.core_type<tc>, window_params = [{transform_indices = @transform_0, window_bounds = array<i64: 1, 27, 64>}, {pipeline_mode = #tpu.pipeline_mode<synchronous>, transform_indices = @transform_1, window_bounds = array<i64: 368, 128>}, {pipeline_mode = #tpu.pipeline_mode<synchronous>, transform_indices = @transform_2, window_bounds = array<i64: 128, 8>}, {transform_indices = @transform_3, window_bounds = array<i64: 1, 128, 1>}]} {
    %c0 = arith.constant 0 : index
    %c0_0 = arith.constant 0 : index
    %0 = vector.load %arg2[%c0, %c0_0] : memref<368x128xbf16, #tpu.memory_space<vmem>>, vector<32x27xbf16>
    %c0_1 = arith.constant 0 : index
    %c0_2 = arith.constant 0 : index
    %c0_3 = arith.constant 0 : index
    %1 = vector.load %arg1[%c0_1, %c0_2, %c0_3] : memref<1x27x64xbf16, #tpu.memory_space<vmem>>, vector<1x27x64xbf16>
    %2 = vector.shape_cast %1 : vector<1x27x64xbf16> to vector<27x64xbf16>
    %cst = arith.constant dense<0.000000e+00> : vector<32x64xf32>
    %3 = tpu.matmul %0, %2, %cst {dimension_numbers = #tpu.dot_dimension_numbers<[1], [0], [0], [1], [0, 0, 1, 1], [], []>} : vector<32x27xbf16>, vector<27x64xbf16>, vector<32x64xf32> -> vector<32x64xf32>
    %c0_4 = arith.constant 0 : index
    %c0_5 = arith.constant 0 : index
    %4 = vector.load %arg3[%c0_4, %c0_5] : memref<128x8xf32, #tpu.memory_space<vmem>>, vector<32x1xf32>
    %5 = vector.broadcast %4 : vector<32x1xf32> to vector<32x64xf32>
    %6 = arith.addf %3, %5 : vector<32x64xf32>
    %7 = arith.negf %6 : vector<32x64xf32>
    %8 = math.exp %7 : vector<32x64xf32>
    %cst_6 = arith.constant 1.000000e+00 : f32
    %9 = vector.broadcast %cst_6 : f32 to vector<32x64xf32>
    %10 = arith.addf %9, %8 : vector<32x64xf32>
    %11 = arith.divf %9, %10 : vector<32x64xf32>
    %12 = arith.mulf %6, %11 : vector<32x64xf32>
    %cst_7 = arith.constant dense<0.000000e+00> : vector<32xf32>
    %13 = vector.multi_reduction <add>, %12, %cst_7 [1] : vector<32x64xf32> to vector<32xf32>
    %14 = vector.shape_cast %13 : vector<32xf32> to vector<32x1xf32>
    %cst_8 = arith.constant 1.562500e-02 : f32
    %15 = vector.broadcast %cst_8 : f32 to vector<32x1xf32>
    %16 = arith.mulf %14, %15 : vector<32x1xf32>
    %17 = arith.truncf %16 : vector<32x1xf32> to vector<32x1xbf16>
    %c32 = arith.constant 32 : index
    %c0_9 = arith.constant 0 : index
    %18 = vector.load %arg2[%c32, %c0_9] : memref<368x128xbf16, #tpu.memory_space<vmem>>, vector<64x32xbf16>
    %cst_10 = arith.constant dense<0.000000e+00> : vector<64x1xf32>
    %19 = tpu.matmul %18, %17, %cst_10 {dimension_numbers = #tpu.dot_dimension_numbers<[1], [0], [0], [1], [0, 0, 1, 1], [], []>} : vector<64x32xbf16>, vector<32x1xbf16>, vector<64x1xf32> -> vector<64x1xf32>
    %c0_11 = arith.constant 0 : index
    %c1 = arith.constant 1 : index
    %20 = vector.load %arg3[%c0_11, %c1] : memref<128x8xf32, #tpu.memory_space<vmem>>, vector<64x1xf32>
    %21 = arith.addf %19, %20 : vector<64x1xf32>
    %cst_12 = arith.constant 0.000000e+00 : f32
    %22 = vector.broadcast %cst_12 : f32 to vector<64x1xf32>
    %23 = arith.maximumf %21, %22 : vector<64x1xf32>
    %24 = arith.truncf %23 : vector<64x1xf32> to vector<64x1xbf16>
    %c224 = arith.constant 224 : index
    %c0_13 = arith.constant 0 : index
    %25 = vector.load %arg2[%c224, %c0_13] : memref<368x128xbf16, #tpu.memory_space<vmem>>, vector<8x64xbf16>
    %cst_14 = arith.constant dense<0.000000e+00> : vector<8x1xf32>
    %26 = tpu.matmul %25, %24, %cst_14 {dimension_numbers = #tpu.dot_dimension_numbers<[1], [0], [0], [1], [0, 0, 1, 1], [], []>} : vector<8x64xbf16>, vector<64x1xbf16>, vector<8x1xf32> -> vector<8x1xf32>
    %c0_15 = arith.constant 0 : index
    %c2 = arith.constant 2 : index
    %27 = vector.load %arg3[%c0_15, %c2] : memref<128x8xf32, #tpu.memory_space<vmem>>, vector<8x1xf32>
    %28 = arith.addf %26, %27 : vector<8x1xf32>
    %cst_16 = arith.constant 0.000000e+00 : f32
    %29 = vector.broadcast %cst_16 : f32 to vector<8x1xf32>
    %30 = arith.maximumf %28, %29 : vector<8x1xf32>
    %c96 = arith.constant 96 : index
    %c0_17 = arith.constant 0 : index
    %31 = vector.load %arg2[%c96, %c0_17] : memref<368x128xbf16, #tpu.memory_space<vmem>>, vector<128x64xbf16>
    %cst_18 = arith.constant dense<0.000000e+00> : vector<128x1xf32>
    %32 = tpu.matmul %31, %24, %cst_18 {dimension_numbers = #tpu.dot_dimension_numbers<[1], [0], [0], [1], [0, 0, 1, 1], [], []>} : vector<128x64xbf16>, vector<64x1xbf16>, vector<128x1xf32> -> vector<128x1xf32>
    %c240 = arith.constant 240 : index
    %c0_19 = arith.constant 0 : index
    %33 = vector.load %arg2[%c240, %c0_19] : memref<368x128xbf16, #tpu.memory_space<vmem>>, vector<128x8xbf16>
    %34 = arith.truncf %30 : vector<8x1xf32> to vector<8x1xbf16>
    %cst_20 = arith.constant dense<0.000000e+00> : vector<128x1xf32>
    %35 = tpu.matmul %33, %34, %cst_20 {dimension_numbers = #tpu.dot_dimension_numbers<[1], [0], [0], [1], [0, 0, 1, 1], [], []>} : vector<128x8xbf16>, vector<8x1xbf16>, vector<128x1xf32> -> vector<128x1xf32>
    %36 = arith.addf %32, %35 : vector<128x1xf32>
    %c0_21 = arith.constant 0 : index
    %c3 = arith.constant 3 : index
    %37 = vector.load %arg3[%c0_21, %c3] : memref<128x8xf32, #tpu.memory_space<vmem>>, vector<128x1xf32>
    %38 = arith.addf %36, %37 : vector<128x1xf32>
    %c0_22 = arith.constant 0 : index
    %c0_23 = arith.constant 0 : index
    %c0_24 = arith.constant 0 : index
    %39 = vector.load %arg4[%c0_22, %c0_23, %c0_24] : memref<1x128x1xf32, #tpu.memory_space<vmem>>, vector<1x128x1xf32>
    %40 = vector.shape_cast %39 : vector<1x128x1xf32> to vector<128x1xf32>
    %41 = vector.shape_cast %38 : vector<128x1xf32> to vector<1x128x1xf32>
    tpu.vector_store %arg4[%c0_22, %c0_23, %c0_24], %41 {strides = array<i32>} : memref<1x128x1xf32, #tpu.memory_space<vmem>>, vector<1x128x1xf32>,
    return
  }
  func.func @transform_0(%arg0: i32) -> (i32, i32, i32) {
    %c0_i32 = arith.constant 0 : i32
    %c0_i32_0 = arith.constant 0 : i32
    %c0_i32_1 = arith.constant 0 : i32
    return %arg0, %c0_i32, %c0_i32_0 : i32, i32, i32
  }
  func.func @transform_1(%arg0: i32) -> (i32, i32) {
    %c0_i32 = arith.constant 0 : i32
    %c0_i32_0 = arith.constant 0 : i32
    %c0_i32_1 = arith.constant 0 : i32
    return %c0_i32, %c0_i32_0 : i32, i32
  }
  func.func @transform_2(%arg0: i32) -> (i32, i32) {
    %c0_i32 = arith.constant 0 : i32
    %c0_i32_0 = arith.constant 0 : i32
    %c0_i32_1 = arith.constant 0 : i32
    return %c0_i32, %c0_i32_0 : i32, i32
  }
  func.func @transform_3(%arg0: i32) -> (i32, i32, i32) {
    %c0_i32 = arith.constant 0 : i32
    %c0_i32_0 = arith.constant 0 : i32
    %c0_i32_1 = arith.constant 0 : i32
    return %arg0, %c0_i32, %c0_i32_0 : i32, i32, i32
  }
}

</mosaic_0001>

<bundles_post_ra>
// kernel: domain_adaptive_net.1
= control target key start
LH: loop header
LB: loop body
LE: loop exit
PB: predicated region body
PF: predicated region fallthrough
CT: control target
= control target key end

     0   :  { %s1163_s12 = smov 0   ;;  %s1417_s0 = inlined_call_operand.vmem [shape: bf16[2,27,64], index: 0, kind: input, shape index: {}]   ;;  %s1418_s1 = inlined_call_operand.vmem [shape: bf16[368,128], index: 1, kind: input, shape index: {}]   ;;  %s1419_s2 = inlined_call_operand.vmem [shape: f32[128,8], index: 2, kind: input, shape index: {}]   ;;  %s1420_s3 = inlined_call_operand.vmem [shape: f32[2,128,1], index: 3, kind: output, shape index: {}]  }
   0x1 LB: > { %s934_s13 = sadd.s32 4294967295, %s1136_s12   ;;  %p938_p0 = scmp.ge.s32.totalorder %s1136_s12, 1  ;;  %s1136_s12 = sphi %s1163_s12, %s13_s12  }
   0x2   : > { %p137_p1 = scmp.lt.s32.totalorder %s1136_s12, 3 }
   0x4   : > { %p138_p2 = pnand %p938_p0, %p137_p1 }
   0x5   : > { %p161_p3 = scmp.lt.s32.totalorder (!%p138_p2), %s934_s13, 1  ;;  %s1140_s30 = smov (!%p138_p2), 127  }
   0x6   : > { %141 = sbr.rel (%p138_p2) target bundleno = 922 (0x39a), region = 32  ;;  %s1141_s22 = smov (!%p138_p2), 126  }
   0x7   : > { %s1142_s25 = smov (!%p138_p2), 125  }
   0xb   : > { %vm232_vm0 = vcmask 1044480   ;;  %v1174_v0 = vld [vmem:[%s1419_s2] sm:$0xff]  ;;  %s1422_s13 = smov (!%p161_p3, %s934_s13), 1  ;;  %v1138_v1 = vmov 0   ;;  %v1181_v2 = vld [vmem:[%s1419_s2 + $0x10] sm:$0xff]  ;;  %vm233_vm1 = vcmask 1045504  }
   0xc   : > { %1113 = vset.pattern.permute.xlu1 %v1138_v1  ;;  %1112 = vset.pattern.permute.xlu0 %v1138_v1  ;;  %v1139_v3 = vmov 65535   ;;  %s1068_s18 = sshll.u32 %s1422_s13, 4  ;;  %v1192_v9 = vld [vmem:[%s1419_s2 + $0x8] sm:$0xff]  ;;  %v1197_v11 = vld [vmem:[%s1419_s2 + $0x18] sm:$0xff]  ;;  %v1070_v13 = vld [vmem:[%s1418_s1] sm:$0xff]  ;;  %vm225_vm2 = vcmask 220160  }
   0xd   : > { %v234_v4 = vsel %vm232_vm0, 4294967295, %v1139_v3  ;;  %186 = vperm.xlu1 %1113, %v1174_v0   ;;  %196 = vperm.xlu0 %1112, %v1181_v2   ;;  %s165_s21 = scalar_lea.vmem %s1417_s0, %s1068_s18  ;;  %v1071_v14 = vld [vmem:[%s1418_s1 + $0x8] sm:$0xff]  ;;  %vm338_vm7 = vcmask 523264   ;;  %s1069_s26 = sshll.u32 %s1422_s13, 7 }
   0xe   : > { %v957_v5 = vld [vmem:[%s165_s21 + $0x8] sm:$0xf]  ;;  %v1073_v6 = vld [vmem:[%s165_s21 + $0x8] sm:$0x30]  ;;  %v235_v7 = vsel %vm233_vm1, %v234_v4, 0  ;;  %v1072_v12 = vld [vmem:[%s165_s21] sm:$0xff]  ;;  %s1380_s29 = scalar_lea.vmem %s1420_s3, %s1069_s26 }
   0xf   : > { %v958_v8 = vor.u32 %v1073_v6, %v957_v5 }
  0x11   : > { %v237_v10 = vand.u32 %v958_v8, %v235_v7 }
  0x13   : > { %245 = vmatpush.bf16.msra.mxu0 %v237_v10 }
  0x15   : > { %191 = vperm.xlu1 %1113, %v1192_v9   ;;  %201 = vperm.xlu0 %1112, %v1197_v11  }
  0x17   : > { %246 = vmatpush.bf16.msra.mxu0 %v1072_v12 }
  0x1a   : > { %959 = vmatmul.msk.bf16.vlgmr.msra.gmra.mxu0 %vm225_vm2, %v1070_v13 }
  0x2a   : > { %960 = vmatmul.msk.bf16.gmra.mxu0 %vm225_vm2, %v1071_v14 }
  0x7f   : > { %v187_v15 = vpop.permute.xlu1 %186  ;;  %v197_v25 = vpop.permute.xlu0 %196 }
  0x87   : > { %v192_v19 = vpop.permute.xlu1 %191  ;;  %v202_v34 = vpop.permute.xlu0 %201 }
  0x97   : > { %v248_v16 = vpop.f32.mrf.mxu0 }
  0x98   : > { %v249_v17 = vadd.f32 %v248_v16, %v187_v15 }
  0x9a   : > { %v961_v18 = vmul.f32 -1.442695, %v249_v17 }
  0x9c   : > { %1114 = vpow2.f32 %v961_v18 }
  0x9f   : > { %v250_v20 = vpop.f32.mrf.mxu0 }
  0xa0   : > { %v251_v21 = vadd.f32 %v250_v20, %v192_v19 }
  0xa2   : > { %v1115_v22 = vpop.eup %1114  ;;  %v962_v23 = vmul.f32 -1.442695, %v251_v21 }
  0xa3   : > { %v270_v24 = vadd.f32 1.0, %v1115_v22 }
  0xa4   : > { %1116 = vpow2.f32 %v962_v23 }
  0xa5   : > { %1118 = vrcp.f32 %v270_v24  ;;  %v285_v36 = vand.u32 2147483648, %v270_v24  ;;  %v283_v39 = vand.u32 2147483647, %v270_v24  ;;  %vm279_vm4 = vweird.f32 %v270_v24 }
  0xa7   : > { %v253_v26 = vpop.f32.mrf.mxu0  ;;  %v286_v45 = vor.u32 1.1754944e-38, %v285_v36  ;;  %vm284_vm6 = vcmp.eq.f32.partialorder %v283_v39, 8.507059e+37  ;;  %v1242_v36 = vld [vmem:[%s1419_s2 + $0x28] sm:$0xff] }
  0xa8   : > { %v1207_v27 = vadd.f32 %v253_v26, %v197_v25 }
  0xaa   : > { %v1117_v28 = vpop.eup %1116  ;;  %v963_v29 = vmul.f32 -1.442695, %v1207_v27 }
  0xab   : > { %v1119_v30 = vpop.eup %1118  ;;  %v271_v31 = vadd.f32 1.0, %v1117_v28  ;;  %v1230_v28 = vld [vmem:[%s1419_s2 + $0x38] sm:$0xff] }
  0xac   : > { %1120 = vpow2.f32 %v963_v29  ;;  %v275_v32 = vmul.f32 %v1119_v30, %v270_v24  ;;  %vm280_vm3 = vweird.f32 %v1119_v30 }
  0xad   : > { %1122 = vrcp.f32 %v271_v31  ;;  %vm281_vm5 = vmor %vm279_vm4, %vm280_vm3  ;;  %v300_v51 = vand.u32 2147483648, %v271_v31  ;;  %v298_v54 = vand.u32 2147483647, %v271_v31  ;;  %vm294_vm9 = vweird.f32 %v271_v31 }
  0xae   : > { %v276_v33 = vsub.f32 1.0, %v275_v32  ;;  %vm425_vm4 = vcmask 261120  }
  0xaf   : > { %v255_v35 = vpop.f32.mrf.mxu0  ;;  %v301_v59 = vor.u32 1.1754944e-38, %v300_v51  ;;  %vm299_vm11 = vcmp.eq.f32.partialorder %v298_v54, 8.507059e+37 }
  0xb0   : > { %v1210_v37 = vadd.f32 %v255_v35, %v202_v34  ;;  %v277_v38 = vmul.f32 %v1119_v30, %v276_v33 }
  0xb2   : > { %v1121_v40 = vpop.eup %1120  ;;  %v964_v41 = vmul.f32 -1.442695, %v1210_v37  ;;  %v278_v42 = vadd.f32 %v1119_v30, %v277_v38 }
  0xb3   : > { %v1123_v43 = vpop.eup %1122  ;;  %v272_v44 = vadd.f32 1.0, %v1121_v40 }
  0xb4   : > { %1124 = vpow2.f32 %v964_v41  ;;  %v282_v46 = vsel %vm281_vm5, %v1119_v30, %v278_v42  ;;  %v290_v47 = vmul.f32 %v1123_v43, %v271_v31  ;;  %vm295_vm8 = vweird.f32 %v1123_v43  ;;  %v1236_v30 = vld [vmem:[%s1419_s2 + $0x20] sm:$0xff]  ;;  %v1074_v41 = vld [vmem:[%s1418_s1 + $0x10] sm:$0xff]  ;;  %v1075_v42 = vld [vmem:[%s1418_s1 + $0x18] sm:$0xff] }
  0xb5   : > { %1126 = vrcp.f32 %v272_v44  ;;  %v287_v48 = vsel %vm284_vm6, %v286_v45, %v282_v46  ;;  %vm296_vm10 = vmor %vm294_vm9, %vm295_vm8  ;;  %v315_v3 = vand.u32 2147483648, %v272_v44  ;;  %v313_v6 = vand.u32 2147483647, %v272_v44 }
  0xb6   : > { %v334_v49 = vmul.f32 %v287_v48, %v249_v17  ;;  %v291_v50 = vsub.f32 1.0, %v290_v47  ;;  %vm309_vm13 = vweird.f32 %v272_v44  ;;  %vm600_vm5 = vcmask 1043456  }
  0xb7   : > { %v316_v10 = vor.u32 1.1754944e-38, %v315_v3  ;;  %vm314_vm15 = vcmp.eq.f32.partialorder %v313_v6, 8.507059e+37  ;;  %vm575_vm6 = vcmask 64512  }
  0xb8   : > { %v339_v52 = vsel %vm338_vm7, %v334_v49, 0.0  ;;  %v292_v53 = vmul.f32 %v1123_v43, %v291_v50 }
  0xb9   : > { %340 = vadd.xlane.f32.xlu0 %v339_v52 }
  0xba   : > { %v1125_v55 = vpop.eup %1124  ;;  %v293_v56 = vadd.f32 %v1123_v43, %v292_v53 }
  0xbb   : > { %v1127_v57 = vpop.eup %1126  ;;  %v273_v58 = vadd.f32 1.0, %v1125_v55 }
  0xbc   : > { %v297_v60 = vsel %vm296_vm10, %v1123_v43, %v293_v56  ;;  %v305_v61 = vmul.f32 %v1127_v57, %v272_v44  ;;  %vm310_vm12 = vweird.f32 %v1127_v57  ;;  %v1076_v43 = vld [vmem:[%s1418_s1 + $0x20] sm:$0xff]  ;;  %v1077_v44 = vld [vmem:[%s1418_s1 + $0x28] sm:$0xff] }
  0xbd   : > { %1128 = vrcp.f32 %v273_v58  ;;  %v302_v62 = vsel %vm299_vm11, %v301_v59, %v297_v60  ;;  %vm311_vm14 = vmor %vm309_vm13, %vm310_vm12  ;;  %v330_v17 = vand.u32 2147483648, %v273_v58  ;;  %v328_v20 = vand.u32 2147483647, %v273_v58 }
  0xbe   : > { %v335_v63 = vmul.f32 %v302_v62, %v251_v21  ;;  %v306_v1 = vsub.f32 1.0, %v305_v61  ;;  %vm324_vm1 = vweird.f32 %v273_v58 }
  0xbf   : > { %v331_v22 = vor.u32 1.1754944e-38, %v330_v17  ;;  %vm329_vm3 = vcmp.eq.f32.partialorder %v328_v20, 8.507059e+37 }
  0xc0   : > { %v342_v4 = vsel %vm338_vm7, %v335_v63, 0.0  ;;  %v307_v5 = vmul.f32 %v1127_v57, %v306_v1 }
  0xc1   : > { %343 = vadd.xlane.f32.xlu1 %v342_v4 }
  0xc2   : > { %v308_v7 = vadd.f32 %v1127_v57, %v307_v5 }
  0xc3   : > { %v1129_v8 = vpop.eup %1128 }
  0xc4   : > { %v312_v12 = vsel %vm311_vm14, %v1127_v57, %v308_v7  ;;  %v320_v13 = vmul.f32 %v1129_v8, %v273_v58  ;;  %vm325_vm0 = vweird.f32 %v1129_v8 }
  0xc5   : > { %v317_v14 = vsel %vm314_vm15, %v316_v10, %v312_v12  ;;  %vm326_vm2 = vmor %vm324_vm1, %vm325_vm0 }
  0xc6   : > { %v336_v15 = vmul.f32 %v317_v14, %v1207_v27  ;;  %v321_v16 = vsub.f32 1.0, %v320_v13  ;;  %v1224_v27 = vld [vmem:[%s1419_s2 + $0x30] sm:$0xff] }
  0xc8   : > { %v345_v18 = vsel %vm338_vm7, %v336_v15, 0.0  ;;  %v322_v19 = vmul.f32 %v1129_v8, %v321_v16 }
  0xc9   : > { %346 = vadd.xlane.f32.xlu2 %v345_v18 }
  0xca   : > { %v323_v21 = vadd.f32 %v1129_v8, %v322_v19 }
  0xcc   : > { %v327_v23 = vsel %vm326_vm2, %v1129_v8, %v323_v21  ;;  %v479_v21 = vld [vmem:[%s1418_s1 + $0x70] sm:$0xf] }
  0xcd   : > { %v332_v24 = vsel %vm329_vm3, %v331_v22, %v327_v23  ;;  %405 = vrot.lane.b32.xlu0 %v1181_v2, %s1140_s30  ;;  %v1080_v22 = vld [vmem:[%s1418_s1 + $0x40] sm:$0xff] }
  0xce   : > { %v337_v25 = vmul.f32 %v332_v24, %v1210_v37 }
  0xd0   : > { %v348_v26 = vsel %vm338_vm7, %v337_v25, 0.0 }
  0xd1   : > { %349 = vadd.xlane.f32.xlu2 %v348_v26 }
  0xd5   : > { %482 = vrot.lane.b32.xlu0 %v1174_v0, %s1141_s22 }
  0xda   : > { %407 = vrot.lane.b32.xlu1 %v1197_v11, %s1140_s30 }
  0xdd   : > { %802 = vrot.lane.b32.xlu0 %v1181_v2, %s1142_s25  ;;  %v1078_v2 = vld [vmem:[%s1418_s1 + $0x30] sm:$0xff] }
  0xe2   : > { %800 = vrot.lane.b32.xlu1 %v1192_v9, %s1142_s25 }
  0xe5   : > { %808 = vrot.lane.b32.xlu0 %v1242_v36, %s1142_s25 }
  0xe9   : > { %413 = vrot.lane.b32.xlu2 %v1224_v27, %s1140_s30 }
  0xea   : > { %806 = vrot.lane.b32.xlu1 %v1236_v30, %s1142_s25 }
  0xf1   : > { %415 = vrot.lane.b32.xlu2 %v1230_v28, %s1140_s30 }
  0xf2   : > { %812 = vrot.lane.b32.xlu1 %v1230_v28, %s1142_s25  ;;  %v1087_v28 = vld [vmem:[%s1418_s1 + $0x80] sm:$0xff] }
  0xf9   : > { %409 = vrot.lane.b32.xlu2 %v1236_v30, %s1140_s30  ;;  %v1082_v30 = vld [vmem:[%s1418_s1 + $0x50] sm:$0xff] }
 0x101   : > { %411 = vrot.lane.b32.xlu2 %v1242_v36, %s1140_s30  ;;  %v1084_v36 = vld [vmem:[%s1418_s1 + $0x60] sm:$0xff] }
 0x109   : > { %401 = vrot.lane.b32.xlu2 %v1174_v0, %s1140_s30 }
 0x111   : > { %403 = vrot.lane.b32.xlu2 %v1192_v9, %s1140_s30  ;;  %v1081_v9 = vld [vmem:[%s1418_s1 + $0x48] sm:$0xff] }
 0x119   : > { %798 = vrot.lane.b32.xlu2 %v1174_v0, %s1142_s25  ;;  %v1079_v0 = vld [vmem:[%s1418_s1 + $0x38] sm:$0xff] }
 0x121   : > { %804 = vrot.lane.b32.xlu2 %v1197_v11, %s1142_s25 }
 0x129   : > { %810 = vrot.lane.b32.xlu2 %v1224_v27, %s1142_s25 }
 0x12c   : > { %v341_v35 = vpop.xlane.xlu0 %340 }
 0x12d   : > { %v351_v39 = vmul.f32 0.015625, %v341_v35  ;;  %v774_v35 = vld [vmem:[%s1419_s2 + $0x40] sm:$0xff] }
 0x12e   : > { %814 = vrot.lane.b32.xlu0 %v774_v35, %s1142_s25 }
 0x134   : > { %v344_v31 = vpop.xlane.xlu1 %343 }
 0x135   : > { %v352_v37 = vmul.f32 0.015625, %v344_v31  ;;  %v1088_v31 = vld [vmem:[%s1418_s1 + $0x88] sm:$0xff] }
 0x137   : > { %v355_v40 = vpack.c.bf16 %v352_v37, %v351_v39  ;;  %v1090_v37 = vld [vmem:[%s1418_s1 + $0x98] sm:$0xff]  ;;  %v1085_v39 = vld [vmem:[%s1418_s1 + $0x68] sm:$0xff] }
 0x13c   : > { %v347_v29 = vpop.xlane.xlu2 %346 }
 0x13d   : > { %v353_v33 = vmul.f32 0.015625, %v347_v29 }
 0x13f   : > { %v406_v3 = vpop.permute.xlu0 %405 }
 0x144   : > { %v350_v32 = vpop.xlane.xlu2 %349 }
 0x145   : > { %v354_v34 = vmul.f32 0.015625, %v350_v32  ;;  %v1083_v32 = vld [vmem:[%s1418_s1 + $0x58] sm:$0xff] }
 0x147   : > { %v356_v38 = vpack.c.bf16 %v354_v34, %v353_v33  ;;  %v483_v11 = vpop.permute.xlu0 %482  ;;  %v1086_v33 = vld [vmem:[%s1418_s1 + $0x78] sm:$0xff]  ;;  %v1089_v34 = vld [vmem:[%s1418_s1 + $0x90] sm:$0xff] }
 0x149   : > { %444 = vmatpush.bf16.msra.mxu1 %v356_v38  ;;  %v776_v38 = vld [vmem:[%s1419_s2 + $0x50] sm:$0xff] }
 0x14a   : > { %818 = vrot.lane.b32.xlu1 %v776_v38, %s1142_s25 }
 0x14c   : > { %v414_v47 = vpop.permute.xlu2 %413  ;;  %v408_v61 = vpop.permute.xlu1 %407 }
 0x14d   : > { %445 = vmatpush.bf16.msra.mxu1 %v355_v40  ;;  %v777_v40 = vld [vmem:[%s1419_s2 + $0x58] sm:$0xff] }
 0x14e   : > { %820 = vrot.lane.b32.xlu0 %v777_v40, %s1142_s25 }
 0x150   : > { %981 = vmatmul.msk.bf16.vlgmr.msra.gmra.mxu1 %vm425_vm4, %v1074_v41  ;;  %v1091_v41 = vld [vmem:[%s1418_s1 + $0xa0] sm:$0xff] }
 0x154   : > { %v416_v49 = vpop.permute.xlu2 %415 }
 0x15c   : > { %v410_v51 = vpop.permute.xlu2 %409 }
 0x160   : > { %982 = vmatmul.msk.bf16.gmra.mxu1 %vm425_vm4, %v1075_v42  ;;  %v775_v42 = vld [vmem:[%s1419_s2 + $0x48] sm:$0xff] }
 0x161   : > { %816 = vrot.lane.b32.xlu2 %v775_v42, %s1142_s25 }
 0x164   : > { %v412_v54 = vpop.permute.xlu2 %411 }
 0x16c   : > { %v402_v56 = vpop.permute.xlu2 %401 }
 0x170   : > { %983 = vmatmul.msk.bf16.gmra.mxu1 %vm425_vm4, %v1076_v43  ;;  %v779_v43 = vld [vmem:[%s1419_s2 + $0x68] sm:$0xff] }
 0x171   : > { %824 = vrot.lane.b32.xlu1 %v779_v43, %s1142_s25 }
 0x174   : > { %v404_v7 = vpop.permute.xlu2 %403 }
 0x180   : > { %984 = vmatmul.msk.bf16.gmra.mxu1 %vm425_vm4, %v1077_v44  ;;  %v780_v44 = vld [vmem:[%s1419_s2 + $0x70] sm:$0xff] }
 0x181   : > { %826 = vrot.lane.b32.xlu0 %v780_v44, %s1142_s25 }
 0x1cd   : > { %v447_v45 = vpop.f32.mrf.mxu1 }
 0x1ce   : > { %v448_v15 = vadd.f32 %v447_v45, %v402_v56  ;;  %v778_v45 = vld [vmem:[%s1419_s2 + $0x60] sm:$0xff] }
 0x1cf   : > { %822 = vrot.lane.b32.xlu2 %v778_v45, %s1142_s25 }
 0x1d0   : > { %v467_v19 = vmax.f32 %v448_v15, 0.0 }
 0x1d5   : > { %v449_v46 = vpop.f32.mrf.mxu1 }
 0x1d6   : > { %v450_v12 = vadd.f32 %v449_v46, %v404_v7  ;;  %v1092_v46 = vld [vmem:[%s1418_s1 + $0xa8] sm:$0xff] }
 0x1d8   : > { %v468_v17 = vmax.f32 %v450_v12, 0.0 }
 0x1da   : > { %v475_v20 = vpack.c.bf16 %v468_v17, %v467_v19 }
 0x1dd   : > { %v452_v48 = vpop.f32.mrf.mxu1 }
 0x1de   : > { %v453_v8 = vadd.f32 %v452_v48, %v406_v3 }
 0x1e0   : > { %v469_v16 = vmax.f32 %v453_v8, 0.0 }
 0x1e5   : > { %v454_v50 = vpop.f32.mrf.mxu1 }
 0x1e6   : > { %v455_v4 = vadd.f32 %v454_v50, %v408_v61 }
 0x1e8   : > { %v470_v13 = vmax.f32 %v455_v4, 0.0 }
 0x1ea   : > { %v476_v18 = vpack.c.bf16 %v470_v13, %v469_v16 }
 0x1ed   : > { %v457_v52 = vpop.f32.mrf.mxu1 }
 0x1ee   : > { %v458_v62 = vadd.f32 %v457_v52, %v410_v51  ;;  %v799_v52 = vpop.permute.xlu2 %798 }
 0x1f0   : > { %v471_v10 = vmax.f32 %v458_v62, 0.0 }
 0x1f5   : > { %v459_v53 = vpop.f32.mrf.mxu1 }
 0x1f6   : > { %v460_v59 = vadd.f32 %v459_v53, %v412_v54  ;;  %v803_v54 = vpop.permute.xlu0 %802 }
 0x1f8   : > { %v472_v5 = vmax.f32 %v460_v59, 0.0 }
 0x1fa   : > { %v477_v14 = vpack.c.bf16 %v472_v5, %v471_v10 }
 0x1fd   : > { %v462_v55 = vpop.f32.mrf.mxu1 }
 0x1fe   : > { %v463_v57 = vadd.f32 %v462_v55, %v414_v47  ;;  %v1093_v47 = vld [vmem:[%s1418_s1 + $0xb0] sm:$0xff] }
 0x200   : > { %v473_v63 = vmax.f32 %v463_v57, 0.0 }
 0x205   : > { %v464_v58 = vpop.f32.mrf.mxu1 }
 0x206   : > { %v465_v60 = vadd.f32 %v464_v58, %v416_v49  ;;  %v781_v49 = vld [vmem:[%s1419_s2 + $0x78] sm:$0xff]  ;;  %v801_v58 = vpop.permute.xlu1 %800 }
 0x207   : > { %828 = vrot.lane.b32.xlu2 %v781_v49, %s1142_s25 }
 0x208   : > { %v474_v1 = vmax.f32 %v465_v60, 0.0  ;;  %v805_v60 = vpop.permute.xlu2 %804 }
 0x20a   : > { %v478_v6 = vpack.c.bf16 %v474_v1, %v473_v63 }
 0x20c   : > { %492 = vmatpush.bf16.msra.mxu2 %v478_v6  ;;  %721 = vmatpush.bf16.msrb.mxu0 %v478_v6 }
 0x20e   : > { %v807_v4 = vpop.permute.xlu1 %806 }
 0x210   : > { %493 = vmatpush.bf16.msra.mxu2 %v477_v14  ;;  %722 = vmatpush.bf16.msrb.mxu0 %v477_v14 }
 0x214   : > { %494 = vmatpush.bf16.msra.mxu2 %v476_v18  ;;  %723 = vmatpush.bf16.msrb.mxu0 %v476_v18 }
 0x218   : > { %495 = vmatpush.bf16.msra.mxu2 %v475_v20  ;;  %724 = vmatpush.bf16.msrb.mxu0 %v475_v20 }
 0x21b   : > { %985 = vmatmul.msk.bf16.vlgmr.msra.gmra.mxu2 %vm338_vm7, %v479_v21  ;;  %1058 = vmatmul.msk.bf16.vlgmr.msrb.gmra.mxu0 %vm338_vm7, %v1078_v2  ;;  %v811_v21 = vpop.permute.xlu2 %810 }
 0x21c   : > { %1095 = vmatpush.bf16.msrb.mxu2 %v478_v6 }
 0x220   : > { %1096 = vmatpush.bf16.msrb.mxu2 %v477_v14  ;;  %v809_v14 = vpop.permute.xlu0 %808 }
 0x224   : > { %1097 = vmatpush.bf16.msrb.mxu2 %v476_v18 }
 0x228   : > { %1098 = vmatpush.bf16.msrb.mxu2 %v475_v20 }
 0x22b   : > { %1059 = vmatmul.msk.bf16.gmra.mxu0 %vm338_vm7, %v1079_v0  ;;  %1061 = vmatmul.msk.bf16.vlgmr.msrb.gmra.mxu2 %vm338_vm7, %v1081_v9 }
 0x23b   : > { %1060 = vmatmul.msk.bf16.gmra.mxu0 %vm338_vm7, %v1080_v22  ;;  %1062 = vmatmul.msk.bf16.gmra.mxu2 %vm338_vm7, %v1082_v30 }
 0x24b   : > { %1063 = vmatmul.msk.bf16.gmra.mxu2 %vm338_vm7, %v1083_v32 }
 0x25b   : > { %1064 = vmatmul.msk.bf16.gmra.mxu2 %vm338_vm7, %v1084_v36 }
 0x26b   : > { %1065 = vmatmul.msk.bf16.gmra.mxu2 %vm338_vm7, %v1085_v39  ;;  %vm862_vm7 = vcmask 7168  }
 0x298   : > { %v726_v48 = vpop.f32.mrf.mxu0 }
 0x29e   : > { %v497_v23 = vpop.f32.mrf.mxu2 }
 0x29f   : > { %v498_v24 = vadd.f32 %v497_v23, %v483_v11  ;;  %v813_v23 = vpop.permute.xlu1 %812 }
 0x2a0   : > { %v728_v50 = vpop.f32.mrf.mxu0 }
 0x2a1   : > { %v501_v25 = vmax.f32 %v498_v24, 0.0 }
 0x2a3   : > { %v534_v26 = vpack.c.bf16 %v501_v25, %v501_v25 }
 0x2a5   : > { %v602_v27 = vsel %vm600_vm5, %v534_v26, 0 }
 0x2a6   : > { %v499_v29 = vpop.f32.mrf.mxu2  ;;  %611 = vmatpush.bf16.msrb.mxu1 %v602_v27  ;;  %1094 = vmatpush.bf16.msra.mxu3 %v602_v27 }
 0x2a7   : > { %v819_v38 = vpop.permute.xlu1 %818 }
 0x2a8   : > { %v731_v51 = vpop.f32.mrf.mxu0 }
 0x2a9   : > { %1019 = vmatmul.msk.bf16.vlgmr.msra.gmra.mxu3 %vm575_vm6, %v1087_v28  ;;  %1018 = vmatmul.msk.bf16.vlgmr.msrb.gmra.mxu1 %vm575_vm6, %v1086_v33  ;;  %v815_v28 = vpop.permute.xlu0 %814  ;;  %v817_v33 = vpop.permute.xlu2 %816 }
 0x2ae   : > { %v741_v1 = vpop.f32.mrf.mxu2 }
 0x2b0   : > { %v733_v56 = vpop.f32.mrf.mxu0 }
 0x2b1   : > { %v821_v42 = vpop.permute.xlu0 %820 }
 0x2b6   : > { %v743_v12 = vpop.f32.mrf.mxu2 }
 0x2b8   : > { %v736_v63 = vpop.f32.mrf.mxu0 }
 0x2b9   : > { %1020 = vmatmul.msk.bf16.gmra.mxu3 %vm575_vm6, %v1088_v31 }
 0x2be   : > { %v746_v9 = vpop.f32.mrf.mxu2 }
 0x2c0   : > { %v738_v8 = vpop.f32.mrf.mxu0 }
 0x2c6   : > { %v748_v26 = vpop.f32.mrf.mxu2 }
 0x2c9   : > { %1021 = vmatmul.msk.bf16.gmra.mxu3 %vm575_vm6, %v1089_v34 }
 0x2ce   : > { %v751_v31 = vpop.f32.mrf.mxu2 }
 0x2d6   : > { %v753_v36 = vpop.f32.mrf.mxu2 }
 0x2d9   : > { %1022 = vmatmul.msk.bf16.gmra.mxu3 %vm575_vm6, %v1090_v37 }
 0x2de   : > { %v756_v44 = vpop.f32.mrf.mxu2 }
 0x2e6   : > { %v758_v49 = vpop.f32.mrf.mxu2 }
 0x2e9   : > { %1023 = vmatmul.msk.bf16.gmra.mxu3 %vm575_vm6, %v1091_v41 }
 0x2f9   : > { %1024 = vmatmul.msk.bf16.gmra.mxu3 %vm575_vm6, %v1092_v46 }
 0x309   : > { %1025 = vmatmul.msk.bf16.gmra.mxu3 %vm575_vm6, %v1093_v47  ;;  %v823_v47 = vpop.permute.xlu2 %822 }
 0x326   : > { %v613_v7 = vpop.f32.mrf.mxu1 }
 0x327   : > { %v727_v10 = vadd.f32 %v726_v48, %v613_v7 }
 0x329   : > { %v846_v15 = vadd.f32 %v799_v52, %v727_v10  ;;  %v825_v52 = vpop.permute.xlu1 %824 }
 0x32b   : > { %863 = vst.msk [vmem:[%s1380_s29] sm:$0xff] %vm862_vm7, %v846_v15 }
 0x32c   : > { %v618_v53 = vpop.f32.mrf.mxu3 }
 0x32d   : > { %v732_v55 = vadd.f32 %v731_v51, %v618_v53 }
 0x32e   : > { %v615_v18 = vpop.f32.mrf.mxu1 }
 0x32f   : > { %v848_v57 = vadd.f32 %v803_v54, %v732_v55  ;;  %v729_v19 = vadd.f32 %v728_v50, %v615_v18  ;;  %v761_v55 = vpop.f32.mrf.mxu2 }
 0x331   : > { %865 = vst.msk [vmem:[%s1380_s29 + $0x10] sm:$0xff] %vm862_vm7, %v848_v57  ;;  %v847_v2 = vadd.f32 %v801_v58, %v729_v19  ;;  %v827_v57 = vpop.permute.xlu0 %826 }
 0x333   : > { %864 = vst.msk [vmem:[%s1380_s29 + $0x8] sm:$0xff] %vm862_vm7, %v847_v2 }
 0x334   : > { %v620_v59 = vpop.f32.mrf.mxu3 }
 0x335   : > { %v734_v61 = vadd.f32 %v733_v56, %v620_v59 }
 0x337   : > { %v849_v62 = vadd.f32 %v805_v60, %v734_v61  ;;  %v763_v60 = vpop.f32.mrf.mxu2 }
 0x339   : > { %866 = vst.msk [vmem:[%s1380_s29 + $0x18] sm:$0xff] %vm862_vm7, %v849_v62  ;;  %v829_v62 = vpop.permute.xlu2 %828 }
 0x33c   : > { %v623_v3 = vpop.f32.mrf.mxu3 }
 0x33d   : > { %v737_v5 = vadd.f32 %v736_v63, %v623_v3 }
 0x33f   : > { %v850_v6 = vadd.f32 %v807_v4, %v737_v5 }
 0x341   : > { %867 = vst.msk [vmem:[%s1380_s29 + $0x20] sm:$0xff] %vm862_vm7, %v850_v6 }
 0x344   : > { %v625_v13 = vpop.f32.mrf.mxu3 }
 0x345   : > { %v739_v16 = vadd.f32 %v738_v8, %v625_v13 }
 0x347   : > { %v851_v17 = vadd.f32 %v809_v14, %v739_v16 }
 0x349   : > { %868 = vst.msk [vmem:[%s1380_s29 + $0x28] sm:$0xff] %vm862_vm7, %v851_v17 }
 0x34c   : > { %v628_v20 = vpop.f32.mrf.mxu3 }
 0x34d   : > { %v742_v0 = vadd.f32 %v741_v1, %v628_v20 }
 0x34f   : > { %v852_v11 = vadd.f32 %v811_v21, %v742_v0 }
 0x351   : > { %869 = vst.msk [vmem:[%s1380_s29 + $0x30] sm:$0xff] %vm862_vm7, %v852_v11 }
 0x354   : > { %v630_v22 = vpop.f32.mrf.mxu3 }
 0x355   : > { %v744_v24 = vadd.f32 %v743_v12, %v630_v22 }
 0x357   : > { %v853_v25 = vadd.f32 %v813_v23, %v744_v24 }
 0x359   : > { %870 = vst.msk [vmem:[%s1380_s29 + $0x38] sm:$0xff] %vm862_vm7, %v853_v25 }
 0x35c   : > { %v633_v27 = vpop.f32.mrf.mxu3 }
 0x35d   : > { %v747_v29 = vadd.f32 %v746_v9, %v633_v27 }
 0x35f   : > { %v854_v30 = vadd.f32 %v815_v28, %v747_v29 }
 0x361   : > { %871 = vst.msk [vmem:[%s1380_s29 + $0x40] sm:$0xff] %vm862_vm7, %v854_v30 }
 0x364   : > { %v635_v32 = vpop.f32.mrf.mxu3 }
 0x365   : > { %v749_v34 = vadd.f32 %v748_v26, %v635_v32 }
 0x367   : > { %v855_v35 = vadd.f32 %v817_v33, %v749_v34 }
 0x369   : > { %872 = vst.msk [vmem:[%s1380_s29 + $0x48] sm:$0xff] %vm862_vm7, %v855_v35 }
 0x36c   : > { %v638_v37 = vpop.f32.mrf.mxu3 }
 0x36d   : > { %v752_v39 = vadd.f32 %v751_v31, %v638_v37 }
 0x36f   : > { %v856_v40 = vadd.f32 %v819_v38, %v752_v39 }
 0x371   : > { %873 = vst.msk [vmem:[%s1380_s29 + $0x50] sm:$0xff] %vm862_vm7, %v856_v40 }
 0x374   : > { %v640_v41 = vpop.f32.mrf.mxu3 }
 0x375   : > { %v754_v43 = vadd.f32 %v753_v36, %v640_v41 }
 0x377   : > { %v857_v45 = vadd.f32 %v821_v42, %v754_v43 }
 0x379   : > { %874 = vst.msk [vmem:[%s1380_s29 + $0x58] sm:$0xff] %vm862_vm7, %v857_v45 }
 0x37c   : > { %v643_v46 = vpop.f32.mrf.mxu3 }
 0x37d   : > { %v757_v48 = vadd.f32 %v756_v44, %v643_v46 }
 0x37f   : > { %v858_v50 = vadd.f32 %v823_v47, %v757_v48 }
 0x381   : > { %875 = vst.msk [vmem:[%s1380_s29 + $0x60] sm:$0xff] %vm862_vm7, %v858_v50 }
 0x384   : > { %v645_v51 = vpop.f32.mrf.mxu3 }
 0x385   : > { %v759_v53 = vadd.f32 %v758_v49, %v645_v51 }
 0x387   : > { %v859_v54 = vadd.f32 %v825_v52, %v759_v53 }
 0x389   : > { %876 = vst.msk [vmem:[%s1380_s29 + $0x68] sm:$0xff] %vm862_vm7, %v859_v54 }
 0x38c   : > { %v648_v56 = vpop.f32.mrf.mxu3 }
 0x38d   : > { %v762_v58 = vadd.f32 %v761_v55, %v648_v56 }
 0x38f   : > { %v860_v59 = vadd.f32 %v827_v57, %v762_v58 }
 0x391   : > { %877 = vst.msk [vmem:[%s1380_s29 + $0x70] sm:$0xff] %vm862_vm7, %v860_v59 }
 0x394   : > { %v650_v61 = vpop.f32.mrf.mxu3 }
 0x395   : > { %v764_v63 = vadd.f32 %v763_v60, %v650_v61 }
 0x397   : > { %v861_v1 = vadd.f32 %v829_v62, %v764_v63 }
 0x399   : > { %878 = vst.msk [vmem:[%s1380_s29 + $0x78] sm:$0xff] %vm862_vm7, %v861_v1 }
 0x39a PF: > { %s13_s12 = sadd.s32 1, %s1136_s12  }
 0x39b   : > { %p10_p4 = scmp.ge.s32.totalorder %s13_s12, 4  }
 0x39d   :  { %12 = sbr.rel (!%p10_p4) target bundleno = 1 (0x1), region = 62 }

</bundles_post_ra>
